<compile_context>
chip_gen: v7x
topology: tpu7x:2x2x1
jax: 0.10.0
libtpu: 0.0.40
codegen_flags: <defaults>
</compile_context>

<pallas_src>
import functools

import jax
import jax.numpy as jnp
from jax.experimental import pallas as pl
from jax.experimental.pallas import tpu as pltpu

_LANES = 128
_SUBLANES = 8
_MAX_BATCH_TILE = 8192          # review: lift the old 1024 cap; budget-limit instead
_MiB = 1024 * 1024


def _round_up(x, m):
    return ((x + m - 1) // m) * m


def _vmem_capacity_bytes():
    """Physical VMEM of the current TPU generation, with a conservative fallback."""
    try:
        cap = getattr(pltpu.get_tpu_info(), "vmem_capacity_bytes", None)
        if cap:
            return int(cap)
    except Exception:
        pass
    return 64 * _MiB   # assume the smallest generation (v7x) if the query fails


def _vmem_plan(vmem_budget_bytes=None):
    """Generation-aware tile budget + scoped-VMEM limit.

    v7x  (64 MiB physical): budget 32 MiB, limit 48 MiB.
    v5e/v6e (128 MiB):      budget 64 MiB, limit 96 MiB.
    """
    cap = _vmem_capacity_bytes()
    limit = (cap * 3) // 4
    budget = cap // 2
    if vmem_budget_bytes is not None:
        budget = int(vmem_budget_bytes)
        limit = min(max(limit, (budget * 3) // 2), (cap * 3) // 4)
    return budget, limit


def _choose_batch_tile(b, d_pad, n_streams, vmem_budget_bytes):
    # Per row: n_streams bf16 embedding lines + f32 weight + f32 packed output,
    # each double-buffered by the automatic pipeline (factor 2).
    bytes_per_row = 2 * (n_streams * d_pad * 2 + 4 + 3 * 4)
    tb = vmem_budget_bytes // bytes_per_row
    tb = (tb // _SUBLANES) * _SUBLANES
    tb = max(_SUBLANES, min(_MAX_BATCH_TILE, tb))
    # Keep >= 2 grid blocks whenever the batch allows it so the "parallel" grid
    # axis can actually shard across the two TensorCores on v7x (no-op on
    # v5e/v6e, which have a single TensorCore).
    if b > _SUBLANES:
        tb = min(tb, _round_up(-(-b // 2), _SUBLANES))
    else:
        tb = _SUBLANES
    return tb


def _pnorm(diff, norm):
    if norm == 1:
        return jnp.sum(jnp.abs(diff), axis=-1, keepdims=True)
    # L2: lane reduce on the XLU, sqrt on the EUP — both off the (load-bound)
    # critical path.
    # TODO(synk): if a VJP is ever added, guard the sqrt with an eps (NaN grad
    # at exactly-zero diff, e.g. zero-padded batch rows or h + r == t).
    return jnp.sqrt(jnp.sum(diff * diff, axis=-1, keepdims=True))


def _store_packed(out_ref, loss, d_pos, d_neg):
    # Direct slice stores (no in-kernel concatenate / lane-placement relayout).
    # TODO(synk): a fully lane-dense (3, B) output (batch on lanes) would also
    # remove the masked partial stores; output bytes are negligible, so the
    # (B, 3) layout is kept for lowering safety.
    out_ref[:, 0:1] = loss
    out_ref[:, 1:2] = d_pos
    out_ref[:, 2:3] = d_neg


def _transe_kernel_general(hp_ref, rp_ref, tp_ref, hn_ref, rn_ref, tn_ref,
                           w_ref, out_ref, *, margin, norm):
    # f32 compute: mandatory on v5e (no bf16 VALU/EUP); on v6e/v7x compute is
    # hidden under the DMA pipeline, so keeping f32 costs nothing.
    f32 = jnp.float32
    diff_p = hp_ref[...].astype(f32) + rp_ref[...].astype(f32) - tp_ref[...].astype(f32)
    diff_n = hn_ref[...].astype(f32) + rn_ref[...].astype(f32) - tn_ref[...].astype(f32)
    d_pos = _pnorm(diff_p, norm)
    d_neg = _pnorm(diff_n, norm)
    loss = jnp.maximum(margin + d_pos - d_neg, 0.0) * w_ref[...]
    _store_packed(out_ref, loss, d_pos, d_neg)


def _transe_kernel_tailcorrupt(hp_ref, rp_ref, tp_ref, tn_ref,
                               w_ref, out_ref, *, margin, norm):
    # Negatives share head/relation with the positives -> reuse h + r and skip
    # two input streams entirely (6 -> 4 streams, ~33% less HBM traffic).
    f32 = jnp.float32
    hr = hp_ref[...].astype(f32) + rp_ref[...].astype(f32)
    diff_p = hr - tp_ref[...].astype(f32)
    diff_n = hr - tn_ref[...].astype(f32)
    d_pos = _pnorm(diff_p, norm)
    d_neg = _pnorm(diff_n, norm)
    loss = jnp.maximum(margin + d_pos - d_neg, 0.0) * w_ref[...]
    _store_packed(out_ref, loss, d_pos, d_neg)


def prepare_transe_tables(entity_emb, relation_emb, param_dtype=jnp.bfloat16):
    """One-time table prep (do this OUTSIDE the training/eval step).

    Casts both tables to `param_dtype` (bf16 by default — halves the dominant
    HBM traffic of this bandwidth-bound kernel; a deliberate precision trade,
    pass jnp.float32 to keep exact f32) and zero-pads the embedding dim to a
    multiple of 128 lanes (zero pad contributes 0 to the p-norm, so numerics
    are otherwise unchanged).
    """
    d = entity_emb.shape[1]
    d_pad = _round_up(d, _LANES)

    def prep(t):
        t = t.astype(param_dtype)
        if d_pad != d:
            t = jnp.pad(t, ((0, 0), (0, d_pad - d)))
        return t

    return prep(entity_emb), prep(relation_emb)


def transe_forward(entity_emb, relation_emb, positive_sample, negative_sample,
                   subsampling_weight, *, margin, norm,
                   negatives_share_head_relation=False,
                   param_dtype=jnp.bfloat16,
                   vmem_budget_bytes=None):
    """positive_sample / negative_sample: int32 [B, 3] = (head, relation, tail).

    For best performance pass tables already prepared by prepare_transe_tables
    (bf16, lane-padded).  Unprepped f32 tables still work, but the gathered
    streams are then cast/padded per call (extra HBM passes).
    """
    b = positive_sample.shape[0]
    d = entity_emb.shape[1]
    d_pad = _round_up(d, _LANES)
    tables_prepped = (entity_emb.dtype == jnp.dtype(param_dtype)
                      and relation_emb.dtype == jnp.dtype(param_dtype)
                      and d == d_pad)

    # --- glue: embedding gathers stay in XLA (see TODO at top of file) -------
    hp = jnp.take(entity_emb, positive_sample[:, 0], axis=0)
    rp = jnp.take(relation_emb, positive_sample[:, 1], axis=0)
    tp = jnp.take(entity_emb, positive_sample[:, 2], axis=0)
    tn = jnp.take(entity_emb, negative_sample[:, 2], axis=0)
    if negatives_share_head_relation:
        # NOTE: trusts the caller that negative head/relation == positive ones;
        # if that is violated the d_neg reported here is wrong.
        streams = [hp, rp, tp, tn]
    else:
        hn = jnp.take(entity_emb, negative_sample[:, 0], axis=0)
        rn = jnp.take(relation_emb, negative_sample[:, 1], axis=0)
        streams = [hp, rp, tp, hn, rn, tn]

    if not tables_prepped:
        # Slow path: per-call cast/pad of the gathered streams.
        streams = [s.astype(param_dtype) for s in streams]
        if d_pad != d:
            streams = [jnp.pad(s, ((0, 0), (0, d_pad - d))) for s in streams]

    w = subsampling_weight.reshape(b, 1).astype(jnp.float32)

    # --- batch tiling from the generation-aware VMEM plan --------------------
    n_streams = len(streams)
    budget, vmem_limit = _vmem_plan(vmem_budget_bytes)
    tb = _choose_batch_tile(b, d_pad, n_streams, budget)
    b_pad = _round_up(b, tb)
    if b_pad != b:
        pad = b_pad - b
        streams = [jnp.pad(s, ((0, pad), (0, 0))) for s in streams]
        w = jnp.pad(w, ((0, pad), (0, 0)))

    kernel = functools.partial(
        _transe_kernel_tailcorrupt if negatives_share_head_relation
        else _transe_kernel_general,
        margin=float(margin), norm=int(norm))

    itemsize = jnp.dtype(streams[0].dtype).itemsize
    cost = pl.CostEstimate(
        flops=8 * b_pad * d_pad,
        transcendentals=(2 * b_pad) if int(norm) == 2 else 0,
        bytes_accessed=n_streams * b_pad * d_pad * itemsize + b_pad * 4 + b_pad * 12)

    row_spec = pl.BlockSpec((tb, d_pad), lambda i: (i, 0))
    out = pl.pallas_call(
        kernel,
        out_shape=jax.ShapeDtypeStruct((b_pad, 3), jnp.float32),
        grid=(b_pad // tb,),
        in_specs=[row_spec] * n_streams + [pl.BlockSpec((tb, 1), lambda i: (i, 0))],
        out_specs=pl.BlockSpec((tb, 3), lambda i: (i, 0)),
        compiler_params=pltpu.CompilerParams(
            dimension_semantics=("parallel",),
            vmem_limit_bytes=int(vmem_limit)),
        cost_estimate=cost,
    )(*streams, w)

    return out[:b, 0], out[:b, 1], out[:b, 2]


def init_transe_params(key, entities_num, relations_num, entity_dimension):
    """Deterministic re-creation of the PyTorch __init__:
         ent = U(-6/sqrt(d), 6/sqrt(d))  of shape (entities_num, entity_dimension)
         rel = L2-row-normalize(ent)     (same shape, as in the reference code)
    """
    del relations_num  # unused by the reference init (kept for signature parity)
    bound = 6.0 / (entity_dimension ** 0.5)
    ent = jax.random.uniform(
        key, (entities_num, entity_dimension), dtype=jnp.float32,
        minval=-bound, maxval=bound)
    norms = jnp.sqrt(jnp.sum(ent * ent, axis=1, keepdims=True))
    rel = ent / jnp.maximum(norms, 1e-12)
    return ent, rel


if __name__ == "__main__":
    margin = 1.0

    def make_batch(key, entities_num, relations_num, entity_dimension, batch):
        k_emb, k_pos, k_neg, k_w = jax.random.split(key, 4)
        ent, rel = init_transe_params(k_emb, entities_num, relations_num,
                                      entity_dimension)
        heads = jax.random.randint(k_pos, (batch,), 0, entities_num)
        rels = jax.random.randint(jax.random.fold_in(k_pos, 1), (batch,), 0,
                                  relations_num)
        tails = jax.random.randint(jax.random.fold_in(k_pos, 2), (batch,), 0,
                                   entities_num)
        ps = jnp.stack([heads, rels, tails], axis=1).astype(jnp.int32)
        neg_tails = jax.random.randint(k_neg, (batch,), 0, entities_num)
        ns = jnp.stack([heads, rels, neg_tails], axis=1).astype(jnp.int32)  # tail corruption
        w = jax.random.uniform(k_w, (batch,), dtype=jnp.float32,
                               minval=0.5, maxval=1.5)
        return ent, rel, ps, ns, w

    def ref(entity_emb, relation_emb, ps, ns, w, norm):
        # mirrors the bf16 storage of the prepared tables
        def g(tbl, idx):
            return jnp.take(tbl, idx, axis=0).astype(jnp.bfloat16).astype(jnp.float32)
        hp = g(entity_emb, ps[:, 0]); rp = g(relation_emb, ps[:, 1]); tp = g(entity_emb, ps[:, 2])
        hn = g(entity_emb, ns[:, 0]); rn = g(relation_emb, ns[:, 1]); tn = g(entity_emb, ns[:, 2])
        if norm == 1:
            dp = jnp.sum(jnp.abs(hp + rp - tp), axis=1)
            dn = jnp.sum(jnp.abs(hn + rn - tn), axis=1)
        else:
            dp = jnp.sqrt(jnp.sum((hp + rp - tp) ** 2, axis=1))
            dn = jnp.sqrt(jnp.sum((hn + rn - tn) ** 2, axis=1))
        return jnp.maximum(margin + dp - dn, 0.0) * w, dp, dn

    root = jax.random.PRNGKey(0)

    # case 1: lane-aligned D=128, general 6-stream path, L2 norm, prepped tables
    ent, rel, ps, ns, w = make_batch(root, entities_num=64, relations_num=16,
                                     entity_dimension=128, batch=16)
    ent_p, rel_p = prepare_transe_tables(ent, rel)          # one-time prep
    loss, dp, dn = transe_forward(ent_p, rel_p, ps, ns, w, margin=margin, norm=2,
                                  negatives_share_head_relation=False)
    jax.block_until_ready((loss, dp, dn))
    rl, rdp, rdn = ref(ent, rel, ps, ns, w, norm=2)
    assert jnp.allclose(loss, rl, atol=1e-4), (loss, rl)
    assert jnp.allclose(dp, rdp, atol=1e-4), (dp, rdp)
    assert jnp.allclose(dn, rdn, atol=1e-4), (dn, rdn)

    # case 2: D=32 (zero-padded to 128 lanes), tail-corruption fast path, L1 norm
    ent2, rel2, ps2, ns2, w2 = make_batch(jax.random.fold_in(root, 1),
                                          entities_num=32, relations_num=8,
                                          entity_dimension=32, batch=8)
    ent2_p, rel2_p = prepare_transe_tables(ent2, rel2)
    loss2, dp2, dn2 = transe_forward(ent2_p, rel2_p, ps2, ns2, w2, margin=margin,
                                     norm=1, negatives_share_head_relation=True)
    jax.block_until_ready((loss2, dp2, dn2))
    rl2, rdp2, rdn2 = ref(ent2, rel2, ps2, ns2, w2, norm=1)
    assert jnp.allclose(loss2, rl2, atol=1e-4), (loss2, rl2)
    assert jnp.allclose(dp2, rdp2, atol=1e-4), (dp2, rdp2)
    assert jnp.allclose(dn2, rdn2, atol=1e-4), (dn2, rdn2)

    print("KERNEL_OK")
</pallas_src>

<mosaic_0001>
module attributes {stable_mosaic.version = 11 : i64} {
  func.func @_transe_kernel_general(%arg0: i32, %arg1: memref<8x128xbf16, #tpu.memory_space<vmem>>, %arg2: memref<8x128xbf16, #tpu.memory_space<vmem>>, %arg3: memref<8x128xbf16, #tpu.memory_space<vmem>>, %arg4: memref<8x128xbf16, #tpu.memory_space<vmem>>, %arg5: memref<8x128xbf16, #tpu.memory_space<vmem>>, %arg6: memref<8x128xbf16, #tpu.memory_space<vmem>>, %arg7: memref<8x1xf32, #tpu.memory_space<vmem>>, %arg8: memref<8x3xf32, #tpu.memory_space<vmem>>) attributes {dimension_semantics = [#tpu.dimension_semantics<parallel>], iteration_bounds = array<i64: 2>, scalar_prefetch = 0 : i64, scratch_operands = 0 : i64, tpu.core_type = #tpu.core_type<tc>, window_params = [{transform_indices = @transform_0, window_bounds = array<i64: 8, 128>}, {transform_indices = @transform_1, window_bounds = array<i64: 8, 128>}, {transform_indices = @transform_2, window_bounds = array<i64: 8, 128>}, {transform_indices = @transform_3, window_bounds = array<i64: 8, 128>}, {transform_indices = @transform_4, window_bounds = array<i64: 8, 128>}, {transform_indices = @transform_5, window_bounds = array<i64: 8, 128>}, {transform_indices = @transform_6, window_bounds = array<i64: 8, 1>}, {transform_indices = @transform_7, window_bounds = array<i64: 8, 3>}]} {
    %c0 = arith.constant 0 : index
    %c0_0 = arith.constant 0 : index
    %0 = vector.load %arg1[%c0, %c0_0] : memref<8x128xbf16, #tpu.memory_space<vmem>>, vector<8x128xbf16>
    %1 = arith.extf %0 : vector<8x128xbf16> to vector<8x128xf32>
    %c0_1 = arith.constant 0 : index
    %c0_2 = arith.constant 0 : index
    %2 = vector.load %arg2[%c0_1, %c0_2] : memref<8x128xbf16, #tpu.memory_space<vmem>>, vector<8x128xbf16>
    %3 = arith.extf %2 : vector<8x128xbf16> to vector<8x128xf32>
    %4 = arith.addf %1, %3 : vector<8x128xf32>
    %c0_3 = arith.constant 0 : index
    %c0_4 = arith.constant 0 : index
    %5 = vector.load %arg3[%c0_3, %c0_4] : memref<8x128xbf16, #tpu.memory_space<vmem>>, vector<8x128xbf16>
    %6 = arith.extf %5 : vector<8x128xbf16> to vector<8x128xf32>
    %7 = arith.subf %4, %6 : vector<8x128xf32>
    %c0_5 = arith.constant 0 : index
    %c0_6 = arith.constant 0 : index
    %8 = vector.load %arg4[%c0_5, %c0_6] : memref<8x128xbf16, #tpu.memory_space<vmem>>, vector<8x128xbf16>
    %9 = arith.extf %8 : vector<8x128xbf16> to vector<8x128xf32>
    %c0_7 = arith.constant 0 : index
    %c0_8 = arith.constant 0 : index
    %10 = vector.load %arg5[%c0_7, %c0_8] : memref<8x128xbf16, #tpu.memory_space<vmem>>, vector<8x128xbf16>
    %11 = arith.extf %10 : vector<8x128xbf16> to vector<8x128xf32>
    %12 = arith.addf %9, %11 : vector<8x128xf32>
    %c0_9 = arith.constant 0 : index
    %c0_10 = arith.constant 0 : index
    %13 = vector.load %arg6[%c0_9, %c0_10] : memref<8x128xbf16, #tpu.memory_space<vmem>>, vector<8x128xbf16>
    %14 = arith.extf %13 : vector<8x128xbf16> to vector<8x128xf32>
    %15 = arith.subf %12, %14 : vector<8x128xf32>
    %16 = arith.mulf %7, %7 : vector<8x128xf32>
    %cst = arith.constant dense<0.000000e+00> : vector<8xf32>
    %17 = vector.multi_reduction <add>, %16, %cst [1] : vector<8x128xf32> to vector<8xf32>
    %18 = vector.shape_cast %17 : vector<8xf32> to vector<8x1xf32>
    %19 = math.sqrt %18 : vector<8x1xf32>
    %20 = arith.mulf %15, %15 : vector<8x128xf32>
    %cst_11 = arith.constant dense<0.000000e+00> : vector<8xf32>
    %21 = vector.multi_reduction <add>, %20, %cst_11 [1] : vector<8x128xf32> to vector<8xf32>
    %22 = vector.shape_cast %21 : vector<8xf32> to vector<8x1xf32>
    %23 = math.sqrt %22 : vector<8x1xf32>
    %cst_12 = arith.constant 1.000000e+00 : f32
    %24 = vector.broadcast %cst_12 : f32 to vector<8x1xf32>
    %25 = arith.addf %24, %19 : vector<8x1xf32>
    %26 = arith.subf %25, %23 : vector<8x1xf32>
    %cst_13 = arith.constant 0.000000e+00 : f32
    %27 = vector.broadcast %cst_13 : f32 to vector<8x1xf32>
    %28 = arith.maximumf %26, %27 : vector<8x1xf32>
    %c0_14 = arith.constant 0 : index
    %c0_15 = arith.constant 0 : index
    %29 = vector.load %arg7[%c0_14, %c0_15] : memref<8x1xf32, #tpu.memory_space<vmem>>, vector<8x1xf32>
    %30 = arith.mulf %28, %29 : vector<8x1xf32>
    %c0_16 = arith.constant 0 : index
    %c0_17 = arith.constant 0 : index
    %31 = vector.load %arg8[%c0_16, %c0_17] : memref<8x3xf32, #tpu.memory_space<vmem>>, vector<8x1xf32>
    tpu.vector_store %arg8[%c0_16, %c0_17], %30 {strides = array<i32>} : memref<8x3xf32, #tpu.memory_space<vmem>>, vector<8x1xf32>,
    %c0_18 = arith.constant 0 : index
    %c1 = arith.constant 1 : index
    %32 = vector.load %arg8[%c0_18, %c1] : memref<8x3xf32, #tpu.memory_space<vmem>>, vector<8x1xf32>
    tpu.vector_store %arg8[%c0_18, %c1], %19 {strides = array<i32>} : memref<8x3xf32, #tpu.memory_space<vmem>>, vector<8x1xf32>,
    %c0_19 = arith.constant 0 : index
    %c2 = arith.constant 2 : index
    %33 = vector.load %arg8[%c0_19, %c2] : memref<8x3xf32, #tpu.memory_space<vmem>>, vector<8x1xf32>
    tpu.vector_store %arg8[%c0_19, %c2], %23 {strides = array<i32>} : memref<8x3xf32, #tpu.memory_space<vmem>>, vector<8x1xf32>,
    return
  }
  func.func @transform_0(%arg0: i32) -> (i32, i32) {
    %c0_i32 = arith.constant 0 : i32
    %c0_i32_0 = arith.constant 0 : i32
    return %arg0, %c0_i32 : i32, i32
  }
  func.func @transform_1(%arg0: i32) -> (i32, i32) {
    %c0_i32 = arith.constant 0 : i32
    %c0_i32_0 = arith.constant 0 : i32
    return %arg0, %c0_i32 : i32, i32
  }
  func.func @transform_2(%arg0: i32) -> (i32, i32) {
    %c0_i32 = arith.constant 0 : i32
    %c0_i32_0 = arith.constant 0 : i32
    return %arg0, %c0_i32 : i32, i32
  }
  func.func @transform_3(%arg0: i32) -> (i32, i32) {
    %c0_i32 = arith.constant 0 : i32
    %c0_i32_0 = arith.constant 0 : i32
    return %arg0, %c0_i32 : i32, i32
  }
  func.func @transform_4(%arg0: i32) -> (i32, i32) {
    %c0_i32 = arith.constant 0 : i32
    %c0_i32_0 = arith.constant 0 : i32
    return %arg0, %c0_i32 : i32, i32
  }
  func.func @transform_5(%arg0: i32) -> (i32, i32) {
    %c0_i32 = arith.constant 0 : i32
    %c0_i32_0 = arith.constant 0 : i32
    return %arg0, %c0_i32 : i32, i32
  }
  func.func @transform_6(%arg0: i32) -> (i32, i32) {
    %c0_i32 = arith.constant 0 : i32
    %c0_i32_0 = arith.constant 0 : i32
    return %arg0, %c0_i32 : i32, i32
  }
  func.func @transform_7(%arg0: i32) -> (i32, i32) {
    %c0_i32 = arith.constant 0 : i32
    %c0_i32_0 = arith.constant 0 : i32
    return %arg0, %c0_i32 : i32, i32
  }
}

</mosaic_0001>

<bundles_post_ra>
// kernel: tpu_custom_call.1
= control target key start
LH: loop header
LB: loop body
LE: loop exit
PB: predicated region body
PF: predicated region fallthrough
CT: control target
= control target key end

     0   :  { %12 = vsyncpa [#allocation3], 0  ;;  %s992_s0 = inlined_call_operand.vmem [shape: bf16[16,128], index: 0, kind: input, shape index: {}]   ;;  %s993_s1 = inlined_call_operand.vmem [shape: bf16[16,128], index: 1, kind: input, shape index: {}]   ;;  %s994_s2 = inlined_call_operand.vmem [shape: bf16[16,128], index: 2, kind: input, shape index: {}]   ;;  %s995_s3 = inlined_call_operand.hbm [shape: bf16[16,128], index: 3, kind: input, shape index: {}]   ;;  %s996_s4 = inlined_call_operand.vmem [shape: bf16[16,128], index: 4, kind: input, shape index: {}]   ;;  %s997_s5 = inlined_call_operand.hbm [shape: bf16[16,128], index: 5, kind: input, shape index: {}]   ;;  %s998_s6 = inlined_call_operand.vmem [shape: f32[16,1], index: 6, kind: input, shape index: {}]   ;;  %s999_s7 = inlined_call_operand.vmem [shape: f32[16,3], index: 7, kind: output, shape index: {}]  }
   0x1   :  { %14 = vsyncpa [#allocation3 + $0x1], 0 }
   0x2   :  { %15 = vsyncpa [#allocation5], 0 }
   0x3   :  { %17 = vsyncpa [#allocation5 + $0x1], 0  ;;  %s819_s24 = smov 0   ;;  %s821_s25 = smov 0  }
   0x4   :  { %s823_s26 = smov 0   ;;  %s825_s27 = smov 0  }
   0x5 LB: > { %s838_s28 = sadd.s32 4294967295, %s775_s27   ;;  %s841_s29 = sadd.s32 1, %s775_s27   ;;  %s775_s27 = sphi %s825_s27, %s1011_s27   ;;  %s771_s26 = sphi %s823_s26, %s1010_s26   ;;  %s767_s25 = sphi %s821_s25, %s1009_s25   ;;  %s763_s24 = sphi %s819_s24, %s1008_s24  }
   0x6   : > { %s105_s30 = ssub.s32 %s775_s27, %s841_s29  ;;  %s108_s8 = sadd.s32 1, %s771_s26 }
   0x7   : > { %p106_p0 = scmp.eq.s32.totalorder %s105_s30, 0  ;;  %p115_p1 = scmp.ne.s32.totalorder %s771_s26, %s767_s25 }
   0x8   : > { %p116_p2 = scmp.eq.s32.totalorder %s775_s27, 0  ;;  %p121_p3 = scmp.ne.s32.totalorder %s767_s25, %s763_s24 }
   0x9   : > { %s851_s9 = scalar_select %p106_p0, %s771_s26, %s108_s8  }
   0xa   : > { %p117_p4 = por %p116_p2, %p115_p1  ;;  %p122_p5 = scmp.eq.s32.totalorder %s838_s28, 0 }
   0xb   : > { %p640_p6 = scmp.lt.s32.totalorder %s775_s27, 2  ;;  %s860_s11 = sand.u32 1, %s771_s26  }
   0xc   : > { %p855_p7 = por %p122_p5, %p121_p3  ;;  %s614_s12 = sshll.u32 %s860_s11, 2 }
   0xd   : > { %s615_s13 = sshll.u32 %s775_s27, 6  ;;  %s274_s17 = scalar_lea.vmem [#allocation2], %s614_s12 }
   0xe   : > { %s1001_s10 = scalar_select %p855_p7, 1, 0 }
   0xf   : > { %s869_s16 = scalar_lea.hbm %s995_s3, %s615_s13  ;;  %s281_s18 = sshll.u32 %s274_s17, 4  ;;  %s873_s18 = int_to_ptr.vmem [resolvable:$true] %s281_s18 }
  0x10   : > { %p875_p8 = pnand %p640_p6, %p117_p4  ;;  %s271_s20 = scalar_lea.sflag [#allocation3], %s860_s11 }
  0x11   : > { %s677_s21 = scalar_lea.hbm %s869_s16, 64  ;;  %s682_s24 = scalar_lea.hbm %s995_s3, 128 }
  0x12   : > { %p678_p11 = scmp.ne.s32.totalorder %s869_s16, %s677_s21  ;;  %p679_p12 = pneg %p875_p8 }
  0x13   : > { %p683_p1 = scmp.lt.u32.totalorder %s869_s16, %s995_s3  ;;  %p684_p2 = scmp.lt.u32.totalorder %s682_s24, %s677_s21 }
  0x14   : > { %p680_p13 = pnand %p679_p12, %p678_p11  ;;  %p686_p4 = scmp.lt.u32.totalorder %s677_s21, %s869_s16 }
  0x15   : > { %p685_p3 = por %p684_p2, %p683_p1 }
  0x16   : > { %p681_p0 = pneg %p680_p13 }
  0x17   : > { %p687_p5 = por %p686_p4, %p685_p3 }
  0x19   : > { %p688_p6 = pnand %p687_p5, %p681_p0 }
  0x1b   : > { %691 = shalt.err (!%p688_p6)
}
  0x1c   : > { %s692_s14 = scalar_lea.vmem %s873_s18, 64  ;;  %s777_s15 = smov [#allocation2]  }
  0x1d   : > { %p693_p11 = scmp.ne.s32.totalorder %s873_s18, %s692_s14  ;;  %s697_s17 = sshll.u32 %s777_s15, 4  ;;  %s698_s17 = int_to_ptr.vmem [resolvable:$false] %s697_s17 }
  0x1e   : > { %s699_s22 = scalar_lea.vmem %s698_s17, 128  ;;  %p700_p10 = scmp.lt.s32.totalorder %s873_s18, %s698_s17 }
  0x1f   : > { %p695_p13 = pnand %p693_p11, %p679_p12  ;;  %p701_p1 = scmp.lt.s32.totalorder %s699_s22, %s692_s14 }
  0x21   : > { %p696_p9 = pneg %p695_p13  ;;  %p702_p2 = por %p701_p1, %p700_p10 }
  0x23   : > { %p703_p3 = pnand %p702_p2, %p696_p9 }
  0x25   : > { %706 = shalt.err (!%p703_p3)
}
  0x26   : > { %636 = dma.hbm_to_vmem [thread:$0]  (!%p875_p8), %s869_s16, 64, %s873_s18, %s271_s20  }
  0x27   : > { %p1003_p0 = scmp.lt.s32.totalorder %s775_s27, 3  ;;  %p1004_p4 = scmp.ge.s32.totalorder %s775_s27, 1 }
  0x28   : > { %s920_s30 = scalar_lea.hbm %s997_s5, %s615_s13  ;;  %s299_s8 = scalar_lea.vmem [#allocation4], %s614_s12 }
  0x29   : > { %p911_p5 = pnand %p1004_p4, %p1003_p0  ;;  %s306_s14 = sshll.u32 %s299_s8, 4  ;;  %s307_s14 = int_to_ptr.vmem [resolvable:$true] %s306_s14 }
  0x2a   : > { %s296_s16 = scalar_lea.sflag [#allocation5], %s860_s11  ;;  %s707_s18 = scalar_lea.hbm %s920_s30, 64 }
  0x2b   : > { %s1005_s21 = scalar_select %p911_p5, 1, 0 }
  0x2c   : > { %p708_p9 = scmp.ne.s32.totalorder %s920_s30, %s707_s18  ;;  %s712_s13 = scalar_lea.hbm %s997_s5, 128 }
  0x2d   : > { %p713_p11 = scmp.lt.u32.totalorder %s920_s30, %s997_s5  ;;  %p714_p13 = scmp.lt.u32.totalorder %s712_s13, %s707_s18 }
  0x2e   : > { %p710_p10 = pnand %p708_p9, %p679_p12  ;;  %p716_p2 = scmp.lt.u32.totalorder %s707_s18, %s920_s30 }
  0x2f   : > { %p715_p1 = por %p714_p13, %p713_p11 }
  0x30   : > { %p711_p6 = pneg %p710_p10 }
  0x31   : > { %p717_p3 = por %p716_p2, %p715_p1 }
  0x33   : > { %p718_p0 = pnand %p717_p3, %p711_p6 }
  0x35   : > { %721 = shalt.err (!%p718_p0)
}
  0x36   : > { %s722_s11 = scalar_lea.vmem %s307_s14, 64  ;;  %s778_s12 = smov [#allocation4]  }
  0x37   : > { %p723_p4 = scmp.ne.s32.totalorder %s307_s14, %s722_s11  ;;  %s727_s22 = sshll.u32 %s778_s12, 4  ;;  %s728_s22 = int_to_ptr.vmem [resolvable:$false] %s727_s22 }
  0x38   : > { %s729_s23 = scalar_lea.vmem %s728_s22, 128  ;;  %p730_p7 = scmp.lt.s32.totalorder %s307_s14, %s728_s22 }
  0x39   : > { %p725_p9 = pnand %p723_p4, %p679_p12  ;;  %p731_p5 = scmp.lt.s32.totalorder %s729_s23, %s722_s11 }
  0x3b   : > { %p726_p10 = pneg %p725_p9  ;;  %p732_p11 = por %p731_p5, %p730_p7 }
  0x3d   : > { %p733_p13 = pnand %p732_p11, %p726_p10 }
  0x3f   : > { %736 = shalt.err (!%p733_p13)
}
  0x40   : > { %639 = dma.hbm_to_vmem [thread:$0]  (!%p875_p8), %s920_s30, 64, %s307_s14, %s296_s16  }
  0x41   : > { %p1006_p6 = scmp.ne.s32.totalorder %s1005_s21, 0 }
  0x42   : > { %s324_s24 = sand.u32 (!%p1006_p6), 1, %s767_s25   ;;  %p1007_p12 = scmp.ne.s32.totalorder (!%p1006_p6), %s1001_s10, 0 }
  0x43   : > { %322 = sbr.rel (%p1006_p6) target bundleno = 262 (0x106), region = 48  ;;  %s619_s8 = sshll.u32 (!%p1006_p6), %s324_s24, 2 }
  0x44   : > { %s325_s18 = scalar_lea.sflag (!%p1006_p6), [#allocation3], %s324_s24  ;;  %s328_s27 = scalar_lea.vmem (!%p1006_p6), [#allocation2], %s619_s8 }
  0x4a   : > { %754 = dma.done.wait (%p1007_p12), %s325_s18, 64  }
  0x4b   : > { %756 = vsyncadd (%p1007_p12), %s325_s18, 4294967232  ;;  %s334_s20 = scalar_lea.sflag [#allocation5], %s324_s24  ;;  %s337_s13 = scalar_lea.vmem [#allocation4], %s619_s8 }
  0x4c   : > { %758 = dma.done.wait (%p1007_p12), %s334_s20, 64  }
  0x4d   : > { %760 = vsyncadd (%p1007_p12), %s334_s20, 4294967232  ;;  %p392_p7 = scmp.lt.s32.totalorder %s838_s28, 1  ;;  %v424_v6 = vld [vmem:[%s328_s27] sm:$0xf]  ;;  %v429_v10 = vld [vmem:[%s337_s13] sm:$0xf] }
  0x4e   : > { %v425_v8 = vunpack.c.l.bf16 %v424_v6  ;;  %v430_v12 = vunpack.c.l.bf16 %v429_v10  ;;  %vm457_vm4 = vcmask 7168   ;;  %vm459_vm5 = vcmask 15368  }
  0x4f   : > { %s1013_s28 = smov (!%p392_p7, %s838_s28), 1  ;;  %vm461_vm6 = vcmask 23568  }
  0x50   : > { %s621_s19 = sshll.u32 %s1013_s28, 2  ;;  %s625_s8 = sshll.u32 %s1013_s28, 3 }
  0x51   : > { %s395_s14 = scalar_lea.vmem %s992_s0, %s621_s19  ;;  %s399_s17 = scalar_lea.vmem %s993_s1, %s621_s19 }
  0x52   : > { %s403_s10 = scalar_lea.vmem %s994_s2, %s621_s19  ;;  %v416_v0 = vld [vmem:[%s395_s14] sm:$0xf]  ;;  %s407_s24 = scalar_lea.vmem %s996_s4, %s621_s19 }
  0x53   : > { %v418_v1 = vld [vmem:[%s399_s17] sm:$0xf]  ;;  %v417_v3 = vunpack.c.l.bf16 %v416_v0  ;;  %s411_s20 = scalar_lea.vmem %s998_s6, %s625_s8  ;;  %s415_s21 = scalar_lea.vmem %s999_s7, %s625_s8 }
  0x54   : > { %v421_v2 = vld [vmem:[%s403_s10] sm:$0xf]  ;;  %v419_v4 = vunpack.c.l.bf16 %v418_v1 }
  0x55   : > { %v422_v5 = vunpack.c.l.bf16 %v421_v2  ;;  %v426_v7 = vld [vmem:[%s407_s24] sm:$0xf] }
  0x56   : > { %v427_v9 = vunpack.c.l.bf16 %v426_v7  ;;  %v420_v11 = vadd.f32 %v419_v4, %v417_v3  ;;  %v455_v32 = vld [vmem:[%s411_s20] sm:$0xff] }
  0x58   : > { %v428_v13 = vadd.f32 %v427_v9, %v425_v8  ;;  %v423_v14 = vsub.f32 %v420_v11, %v422_v5 }
  0x5a   : > { %v431_v15 = vsub.f32 %v428_v13, %v430_v12  ;;  %v432_v16 = vmul.f32 %v423_v14, %v423_v14 }
  0x5c   : > { %433 = vadd.xlane.f32.xlu0 %v432_v16  ;;  %v442_v17 = vmul.f32 %v431_v15, %v431_v15 }
  0x60   : > { %443 = vadd.xlane.f32.xlu0 %v442_v17 }
  0xe9   : > { %v434_v18 = vpop.xlane.xlu0 %433 }
  0xea   : > { %673 = vrsqrt.f32 %v434_v18  ;;  %vm437_vm0 = vcmp.eq.f32.partialorder %v434_v18, inf  ;;  %v440_v22 = vand.u32 2147483648, %v434_v18  ;;  %vm439_vm1 = vcmp.eq.f32.partialorder %v434_v18, 0.0 }
  0xed   : > { %v444_v19 = vpop.xlane.xlu0 %443 }
  0xee   : > { %675 = vrsqrt.f32 %v444_v19  ;;  %vm447_vm2 = vcmp.eq.f32.partialorder %v444_v19, inf  ;;  %v450_v27 = vand.u32 2147483648, %v444_v19  ;;  %vm449_vm3 = vcmp.eq.f32.partialorder %v444_v19, 0.0 }
  0xf4   : > { %v674_v20 = vpop.eup %673 }
  0xf5   : > { %v436_v21 = vmul.f32 %v674_v20, %v434_v18 }
  0xf7   : > { %v438_v23 = vsel %vm437_vm0, %v434_v18, %v436_v21 }
  0xf8   : > { %v676_v24 = vpop.eup %675  ;;  %v441_v25 = vsel %vm439_vm1, %v440_v22, %v438_v23 }
  0xf9   : > { %v446_v26 = vmul.f32 %v676_v24, %v444_v19  ;;  %v452_v28 = vadd.f32 1.0, %v441_v25 }
  0xfb   : > { %v448_v29 = vsel %vm447_vm2, %v444_v19, %v446_v26 }
  0xfc   : > { %v451_v30 = vsel %vm449_vm3, %v450_v27, %v448_v29 }
  0xfd   : > { %v453_v31 = vsub.f32 %v452_v28, %v451_v30 }
  0xff   : > { %v454_v33 = vmax.f32 %v453_v31, 0.0 }
 0x101   : > { %v456_v34 = vmul.f32 %v455_v32, %v454_v33 }
 0x103   : > { %458 = vst.msk [vmem:[%s415_s21] sm:$0xff] %vm457_vm4, %v456_v34 }
 0x104   : > { %460 = vst.msk [vmem:[%s415_s21] sm:$0xff] %vm459_vm5, %v441_v25 }
 0x105   : > { %462 = vst.msk [vmem:[%s415_s21] sm:$0xff] %vm461_vm6, %v451_v30 }
 0x106 PF: > { %p20_p8 = scmp.ge.s32.totalorder %s841_s29, 4   ;;  %s1008_s24 = smov %s767_s25 }
 0x107   : > { %s1009_s25 = smov %s771_s26  ;;  %s1010_s26 = smov %s851_s9 }
 0x108   : > { %s1011_s27 = smov %s841_s29  ;;  %22 = sbr.rel (!%p20_p8) target bundleno = 5 (0x5), region = 116 }
 0x10f   :  { %482 = vsyncpa [#allocation3], 1 }
 0x110   :  { %484 = vsyncpa [#allocation3 + $0x1], 1 }
 0x111   :  { %485 = vsyncpa [#allocation5], 1 }
 0x112   :  { %487 = vsyncpa [#allocation5 + $0x1], 1 }

</bundles_post_ra>
